<compile_context>
chip_gen: v7x
topology: tpu7x:2x2x1
jax: 0.10.0
libtpu: 0.0.40
codegen_flags: <defaults>
</compile_context>

<pallas_src>
import functools

import jax
import jax.numpy as jnp
import numpy as np
from jax.experimental import pallas as pl
from jax.experimental.pallas import tpu as pltpu


def _vmem_limit_bytes():
    """Generation-aware VMEM hint (v7x: 64 MiB physical, v5e/v6e: 128 MiB)."""
    try:
        cap = getattr(pltpu.get_tpu_info(), "vmem_capacity_bytes", None)
        if cap:
            return min(int(cap * 3 // 4), 100 * 1024 * 1024)
    except Exception:
        pass
    return 48 * 1024 * 1024


# ---------------- fused kernel: conv(4,2,1)^T + InstanceNorm + ReLU ----------
def _decoder_kernel(xflat_ref, w_ref, mask_ref, out_ref, *, h, w, eps):
    """Processes ONE image (grid axis = batch).

    xflat_ref : (1, Cin, (H+2)*(W+2)+2) bf16  padded input, flattened spatial
    w_ref     : (4, Cout, 4*Cin)        bf16  per-phase folded-tap weights (resident)
    mask_ref  : (1, H*(W+2))            f32   1.0 on real columns, 0.0 on halo cols
    out_ref   : (1, 4, Cout, H*(W+2))   f32   normalized+ReLU output, phase layout
    """
    wp = w + 2                 # row width including the 2 halo columns
    t = h * wp                 # flattened output positions per phase (incl. halo)
    inv_count = 1.0 / (4.0 * h * w)

    # 9 distinct 2x2-neighbourhood taps, shared by the 4 output phases.
    # Each is a contiguous lane slice of the VMEM-resident padded input —
    # no HBM patches, no in-kernel reshape.
    taps = {}
    for a in range(3):
        for b in range(3):
            s0 = a * wp + b
            taps[(a, b)] = xflat_ref[0, :, s0:s0 + t]          # (Cin, t) bf16

    mask = mask_ref[...]                                       # (1, t) f32

    # Sub-pixel decomposition: one folded-tap matmul per output phase.
    # out[n,co,2p+ph,2q+pw] = sum_{dh,dw,ci} xpad[n,ci,p+ph+dh,q+pw+dw]
    #                                        * W[ci,co,3-ph-2dh,3-pw-2dw]
    # TODO(synk): for Cout << MXU width, merge the 4 phases into a single
    # (4*Cout, 9*Cin) x (9*Cin, t) matmul (zero blocks) for better row fill.
    ys = []
    for ph in range(2):
        for pw in range(2):
            rhs = jnp.concatenate(
                [taps[(ph + dh, pw + dw)] for dh in range(2) for dw in range(2)],
                axis=0)                                        # (4*Cin, t) bf16
            ys.append(jnp.dot(w_ref[2 * ph + pw], rhs,
                              preferred_element_type=jnp.float32))  # (Cout, t) f32

    # InstanceNorm statistics over all phases & valid positions (centered pass).
    sum_ = jnp.sum(ys[0] * mask, axis=1, keepdims=True)
    for yi in ys[1:]:
        sum_ += jnp.sum(yi * mask, axis=1, keepdims=True)
    mean = sum_ * inv_count                                    # (Cout, 1)

    d0 = (ys[0] - mean) * mask
    ssq = jnp.sum(d0 * d0, axis=1, keepdims=True)
    for yi in ys[1:]:
        d = (yi - mean) * mask
        ssq += jnp.sum(d * d, axis=1, keepdims=True)
    rstd = jax.lax.rsqrt(ssq * inv_count + eps)                # (Cout, 1)

    # Normalize + ReLU; one direct sub-slice store per phase plane.
    for i, yi in enumerate(ys):
        out_ref[0, i] = jnp.maximum((yi - mean) * rstd, 0.0)


def decoder_forward(x_nchw, skip_nchw, weight, *, eps=1e-5):
    """x_nchw: (N,Cin,H,W); skip_nchw: (N,Cskip,2H,2W); weight: (Cin,Cout,4,4)."""
    n, cin, h, w = x_nchw.shape
    assert weight.shape[0] == cin and weight.shape[2:] == (4, 4)
    cout = weight.shape[1]
    wp = w + 2
    t = h * wp                      # per-phase flattened positions (incl. halo cols)
    L = (h + 2) * wp + 2            # flattened padded input length (+2 guard elems)
    k = 4 * cin

    # ---- input: single padded bf16 image, flattened spatial ------------------
    xq = x_nchw.astype(jnp.bfloat16)
    xpad = jnp.pad(xq, ((0, 0), (0, 0), (1, 1), (1, 1)))
    xflat = jnp.pad(xpad.reshape(n, cin, (h + 2) * wp), ((0, 0), (0, 0), (0, 2)))

    # ---- weights: (4 phases, Cout, 4*Cin), folded-tap layout, bf16 -----------
    phase_w = []
    for ph in range(2):
        for pw in range(2):
            blocks = [weight[:, :, 3 - ph - 2 * dh, 3 - pw - 2 * dw]
                      for dh in range(2) for dw in range(2)]   # each (Cin, Cout)
            phase_w.append(jnp.concatenate(blocks, axis=0))    # (4*Cin, Cout)
    wmat = jnp.stack(phase_w, axis=0).transpose(0, 2, 1).astype(jnp.bfloat16)

    # ---- validity mask for the 2 halo columns of every row (tiny, resident) --
    mask = jnp.asarray((np.arange(t) % wp < w).astype(np.float32)).reshape(1, t)

    vmem_limit = _vmem_limit_bytes()
    cost = pl.CostEstimate(
        flops=2 * n * 4 * cout * k * t,
        transcendentals=n * cout,
        bytes_accessed=int(xflat.size * 2 + wmat.size * 2 + mask.size * 4
                           + n * 4 * cout * t * 4))

    kernel = functools.partial(_decoder_kernel, h=h, w=w, eps=eps)
    # TODO(synk): spatially-tiled two-pass fallback for images whose per-image
    # activations exceed VMEM (only needed for very large H*W on v7x's 64 MiB).
    # TODO(synk): at N=1 on v7x, split the spatial axis across the two
    # TensorCores and combine the partial InstanceNorm statistics (megacore).
    y = pl.pallas_call(
        kernel,
        out_shape=jax.ShapeDtypeStruct((n, 4, cout, t), jnp.float32),
        grid=(n,),
        in_specs=[
            pl.BlockSpec((1, cin, L), lambda i: (i, 0, 0)),      # per-image input
            pl.BlockSpec((4, cout, k), lambda i: (0, 0, 0)),     # weights: resident
            pl.BlockSpec((1, t), lambda i: (0, 0)),              # mask: resident
        ],
        out_specs=pl.BlockSpec((1, 4, cout, t), lambda i: (i, 0, 0, 0)),
        compiler_params=pltpu.CompilerParams(
            dimension_semantics=("parallel",),
            vmem_limit_bytes=vmem_limit),
        cost_estimate=cost,
    )(xflat, wmat, mask)

    # ---- phase layout -> NCHW (crop halo cols), then concat with skip --------
    y = y.reshape(n, 2, 2, cout, h, wp)[..., :w]                 # (n,ph,pw,C,h,w)
    y = jnp.transpose(y, (0, 3, 4, 1, 5, 2)).reshape(n, cout, 2 * h, 2 * w)
    return jnp.concatenate([y, skip_nchw.astype(y.dtype)], axis=1)
    # TODO(synk): nn.Dropout not implemented (module default dropout=0.0 adds no layer).


def decoder_reference(x, skip, weight, *, eps=1e-5):
    """Pure-JAX reference built directly from the ConvTranspose2d definition.

    Matmul inputs are quantized to bf16 (then computed in f32) so the check
    isolates kernel correctness from the intended bf16 MXU precision."""
    n, cin, h, w = x.shape
    cout = weight.shape[1]
    hout, wout = 2 * h, 2 * w
    xq = x.astype(jnp.bfloat16).astype(jnp.float32)
    wq = weight.astype(jnp.bfloat16).astype(jnp.float32)
    tprod = jnp.einsum("nchw,cokl->noklhw", xq, wq)
    ypad = jnp.zeros((n, cout, hout + 2, wout + 2), jnp.float32)
    for kh in range(4):
        for kw in range(4):
            ypad = ypad.at[:, :, kh:kh + hout:2, kw:kw + wout:2].add(tprod[:, :, kh, kw])
    y = ypad[:, :, 1:1 + hout, 1:1 + wout]
    mean = y.mean(axis=(2, 3), keepdims=True)
    var = ((y - mean) ** 2).mean(axis=(2, 3), keepdims=True)
    y = jnp.maximum((y - mean) / jnp.sqrt(var + eps), 0.0)
    return jnp.concatenate([y, skip], axis=1)


if __name__ == "__main__":
    key = jax.random.PRNGKey(0)
    kx, ks, kw = jax.random.split(key, 3)

    N, CIN, H, W = 2, 16, 8, 8       # n_input=16
    COUT, CSKIP = 8, 8               # n_output=8, U-Net skip with 8 channels

    x = jax.random.normal(kx, (N, CIN, H, W), jnp.float32)
    skip = jax.random.normal(ks, (N, CSKIP, 2 * H, 2 * W), jnp.float32)
    # ConvTranspose2d weight, PyTorch layout (Cin, Cout, kH, kW)
    weight = 0.1 * jax.random.normal(kw, (CIN, COUT, 4, 4), jnp.float32)

    fwd = jax.jit(decoder_forward)
    out = jax.block_until_ready(fwd(x, skip, weight))
    assert out.shape == (N, COUT + CSKIP, 2 * H, 2 * W)

    ref = decoder_reference(x, skip, weight)
    np.testing.assert_allclose(np.asarray(out), np.asarray(ref), rtol=1e-4, atol=1e-4)

    print("KERNEL_OK")
</pallas_src>

<mosaic_0001>
module attributes {stable_mosaic.version = 11 : i64} {
  func.func @_decoder_kernel(%arg0: i32, %arg1: memref<1x16x102xbf16, #tpu.memory_space<vmem>>, %arg2: memref<4x8x64xbf16, #tpu.memory_space<vmem>>, %arg3: memref<1x80xf32, #tpu.memory_space<vmem>>, %arg4: memref<1x4x8x80xf32, #tpu.memory_space<vmem>>) attributes {dimension_semantics = [#tpu.dimension_semantics<parallel>], iteration_bounds = array<i64: 2>, scalar_prefetch = 0 : i64, scratch_operands = 0 : i64, tpu.core_type = #tpu.core_type<tc>, window_params = [{transform_indices = @transform_0, window_bounds = array<i64: 1, 16, 102>}, {pipeline_mode = #tpu.pipeline_mode<synchronous>, transform_indices = @transform_1, window_bounds = array<i64: 4, 8, 64>}, {pipeline_mode = #tpu.pipeline_mode<synchronous>, transform_indices = @transform_2, window_bounds = array<i64: 1, 80>}, {transform_indices = @transform_3, window_bounds = array<i64: 1, 4, 8, 80>}]} {
    %c0 = arith.constant 0 : index
    %c0_0 = arith.constant 0 : index
    %c0_1 = arith.constant 0 : index
    %0 = vector.load %arg1[%c0, %c0_0, %c0_1] : memref<1x16x102xbf16, #tpu.memory_space<vmem>>, vector<1x16x80xbf16>
    %1 = vector.shape_cast %0 : vector<1x16x80xbf16> to vector<16x80xbf16>
    %c0_2 = arith.constant 0 : index
    %c0_3 = arith.constant 0 : index
    %c1 = arith.constant 1 : index
    %2 = vector.load %arg1[%c0_2, %c0_3, %c1] : memref<1x16x102xbf16, #tpu.memory_space<vmem>>, vector<1x16x80xbf16>
    %3 = vector.shape_cast %2 : vector<1x16x80xbf16> to vector<16x80xbf16>
    %c0_4 = arith.constant 0 : index
    %c0_5 = arith.constant 0 : index
    %c2 = arith.constant 2 : index
    %4 = vector.load %arg1[%c0_4, %c0_5, %c2] : memref<1x16x102xbf16, #tpu.memory_space<vmem>>, vector<1x16x80xbf16>
    %5 = vector.shape_cast %4 : vector<1x16x80xbf16> to vector<16x80xbf16>
    %c0_6 = arith.constant 0 : index
    %c0_7 = arith.constant 0 : index
    %c10 = arith.constant 10 : index
    %6 = vector.load %arg1[%c0_6, %c0_7, %c10] : memref<1x16x102xbf16, #tpu.memory_space<vmem>>, vector<1x16x80xbf16>
    %7 = vector.shape_cast %6 : vector<1x16x80xbf16> to vector<16x80xbf16>
    %c0_8 = arith.constant 0 : index
    %c0_9 = arith.constant 0 : index
    %c11 = arith.constant 11 : index
    %8 = vector.load %arg1[%c0_8, %c0_9, %c11] : memref<1x16x102xbf16, #tpu.memory_space<vmem>>, vector<1x16x80xbf16>
    %9 = vector.shape_cast %8 : vector<1x16x80xbf16> to vector<16x80xbf16>
    %c0_10 = arith.constant 0 : index
    %c0_11 = arith.constant 0 : index
    %c12 = arith.constant 12 : index
    %10 = vector.load %arg1[%c0_10, %c0_11, %c12] : memref<1x16x102xbf16, #tpu.memory_space<vmem>>, vector<1x16x80xbf16>
    %11 = vector.shape_cast %10 : vector<1x16x80xbf16> to vector<16x80xbf16>
    %c0_12 = arith.constant 0 : index
    %c0_13 = arith.constant 0 : index
    %c20 = arith.constant 20 : index
    %12 = vector.load %arg1[%c0_12, %c0_13, %c20] : memref<1x16x102xbf16, #tpu.memory_space<vmem>>, vector<1x16x80xbf16>
    %13 = vector.shape_cast %12 : vector<1x16x80xbf16> to vector<16x80xbf16>
    %c0_14 = arith.constant 0 : index
    %c0_15 = arith.constant 0 : index
    %c21 = arith.constant 21 : index
    %14 = vector.load %arg1[%c0_14, %c0_15, %c21] : memref<1x16x102xbf16, #tpu.memory_space<vmem>>, vector<1x16x80xbf16>
    %15 = vector.shape_cast %14 : vector<1x16x80xbf16> to vector<16x80xbf16>
    %c0_16 = arith.constant 0 : index
    %c0_17 = arith.constant 0 : index
    %c22 = arith.constant 22 : index
    %16 = vector.load %arg1[%c0_16, %c0_17, %c22] : memref<1x16x102xbf16, #tpu.memory_space<vmem>>, vector<1x16x80xbf16>
    %17 = vector.shape_cast %16 : vector<1x16x80xbf16> to vector<16x80xbf16>
    %c0_18 = arith.constant 0 : index
    %c0_19 = arith.constant 0 : index
    %18 = vector.load %arg3[%c0_18, %c0_19] : memref<1x80xf32, #tpu.memory_space<vmem>>, vector<1x80xf32>
    %19 = tpu.concatenate %1, %3, %7, %9 in 0 : vector<16x80xbf16>, vector<16x80xbf16>, vector<16x80xbf16>, vector<16x80xbf16> -> vector<64x80xbf16>
    %c0_20 = arith.constant 0 : index
    %c0_21 = arith.constant 0 : index
    %c0_22 = arith.constant 0 : index
    %20 = vector.load %arg2[%c0_20, %c0_21, %c0_22] : memref<4x8x64xbf16, #tpu.memory_space<vmem>>, vector<1x8x64xbf16>
    %21 = vector.shape_cast %20 : vector<1x8x64xbf16> to vector<8x64xbf16>
    %cst = arith.constant dense<0.000000e+00> : vector<8x80xf32>
    %22 = tpu.matmul %21, %19, %cst {dimension_numbers = #tpu.dot_dimension_numbers<[1], [0], [0], [1], [0, 0, 1, 1], [], []>} : vector<8x64xbf16>, vector<64x80xbf16>, vector<8x80xf32> -> vector<8x80xf32>
    %23 = tpu.concatenate %3, %5, %9, %11 in 0 : vector<16x80xbf16>, vector<16x80xbf16>, vector<16x80xbf16>, vector<16x80xbf16> -> vector<64x80xbf16>
    %c1_23 = arith.constant 1 : index
    %c0_24 = arith.constant 0 : index
    %c0_25 = arith.constant 0 : index
    %24 = vector.load %arg2[%c1_23, %c0_24, %c0_25] : memref<4x8x64xbf16, #tpu.memory_space<vmem>>, vector<1x8x64xbf16>
    %25 = vector.shape_cast %24 : vector<1x8x64xbf16> to vector<8x64xbf16>
    %cst_26 = arith.constant dense<0.000000e+00> : vector<8x80xf32>
    %26 = tpu.matmul %25, %23, %cst_26 {dimension_numbers = #tpu.dot_dimension_numbers<[1], [0], [0], [1], [0, 0, 1, 1], [], []>} : vector<8x64xbf16>, vector<64x80xbf16>, vector<8x80xf32> -> vector<8x80xf32>
    %27 = tpu.concatenate %7, %9, %13, %15 in 0 : vector<16x80xbf16>, vector<16x80xbf16>, vector<16x80xbf16>, vector<16x80xbf16> -> vector<64x80xbf16>
    %c2_27 = arith.constant 2 : index
    %c0_28 = arith.constant 0 : index
    %c0_29 = arith.constant 0 : index
    %28 = vector.load %arg2[%c2_27, %c0_28, %c0_29] : memref<4x8x64xbf16, #tpu.memory_space<vmem>>, vector<1x8x64xbf16>
    %29 = vector.shape_cast %28 : vector<1x8x64xbf16> to vector<8x64xbf16>
    %cst_30 = arith.constant dense<0.000000e+00> : vector<8x80xf32>
    %30 = tpu.matmul %29, %27, %cst_30 {dimension_numbers = #tpu.dot_dimension_numbers<[1], [0], [0], [1], [0, 0, 1, 1], [], []>} : vector<8x64xbf16>, vector<64x80xbf16>, vector<8x80xf32> -> vector<8x80xf32>
    %31 = tpu.concatenate %9, %11, %15, %17 in 0 : vector<16x80xbf16>, vector<16x80xbf16>, vector<16x80xbf16>, vector<16x80xbf16> -> vector<64x80xbf16>
    %c3 = arith.constant 3 : index
    %c0_31 = arith.constant 0 : index
    %c0_32 = arith.constant 0 : index
    %32 = vector.load %arg2[%c3, %c0_31, %c0_32] : memref<4x8x64xbf16, #tpu.memory_space<vmem>>, vector<1x8x64xbf16>
    %33 = vector.shape_cast %32 : vector<1x8x64xbf16> to vector<8x64xbf16>
    %cst_33 = arith.constant dense<0.000000e+00> : vector<8x80xf32>
    %34 = tpu.matmul %33, %31, %cst_33 {dimension_numbers = #tpu.dot_dimension_numbers<[1], [0], [0], [1], [0, 0, 1, 1], [], []>} : vector<8x64xbf16>, vector<64x80xbf16>, vector<8x80xf32> -> vector<8x80xf32>
    %35 = vector.broadcast %18 : vector<1x80xf32> to vector<8x80xf32>
    %36 = arith.mulf %22, %35 : vector<8x80xf32>
    %cst_34 = arith.constant dense<0.000000e+00> : vector<8xf32>
    %37 = vector.multi_reduction <add>, %36, %cst_34 [1] : vector<8x80xf32> to vector<8xf32>
    %38 = vector.shape_cast %37 : vector<8xf32> to vector<8x1xf32>
    %39 = vector.broadcast %18 : vector<1x80xf32> to vector<8x80xf32>
    %40 = arith.mulf %26, %39 : vector<8x80xf32>
    %cst_35 = arith.constant dense<0.000000e+00> : vector<8xf32>
    %41 = vector.multi_reduction <add>, %40, %cst_35 [1] : vector<8x80xf32> to vector<8xf32>
    %42 = vector.shape_cast %41 : vector<8xf32> to vector<8x1xf32>
    %43 = arith.addf %38, %42 : vector<8x1xf32>
    %44 = vector.broadcast %18 : vector<1x80xf32> to vector<8x80xf32>
    %45 = arith.mulf %30, %44 : vector<8x80xf32>
    %cst_36 = arith.constant dense<0.000000e+00> : vector<8xf32>
    %46 = vector.multi_reduction <add>, %45, %cst_36 [1] : vector<8x80xf32> to vector<8xf32>
    %47 = vector.shape_cast %46 : vector<8xf32> to vector<8x1xf32>
    %48 = arith.addf %43, %47 : vector<8x1xf32>
    %49 = vector.broadcast %18 : vector<1x80xf32> to vector<8x80xf32>
    %50 = arith.mulf %34, %49 : vector<8x80xf32>
    %cst_37 = arith.constant dense<0.000000e+00> : vector<8xf32>
    %51 = vector.multi_reduction <add>, %50, %cst_37 [1] : vector<8x80xf32> to vector<8xf32>
    %52 = vector.shape_cast %51 : vector<8xf32> to vector<8x1xf32>
    %53 = arith.addf %48, %52 : vector<8x1xf32>
    %cst_38 = arith.constant 3.906250e-03 : f32
    %54 = vector.broadcast %cst_38 : f32 to vector<8x1xf32>
    %55 = arith.mulf %53, %54 : vector<8x1xf32>
    %56 = vector.broadcast %55 : vector<8x1xf32> to vector<8x80xf32>
    %57 = arith.subf %22, %56 : vector<8x80xf32>
    %58 = vector.broadcast %18 : vector<1x80xf32> to vector<8x80xf32>
    %59 = arith.mulf %57, %58 : vector<8x80xf32>
    %60 = arith.mulf %59, %59 : vector<8x80xf32>
    %cst_39 = arith.constant dense<0.000000e+00> : vector<8xf32>
    %61 = vector.multi_reduction <add>, %60, %cst_39 [1] : vector<8x80xf32> to vector<8xf32>
    %62 = vector.shape_cast %61 : vector<8xf32> to vector<8x1xf32>
    %63 = vector.broadcast %55 : vector<8x1xf32> to vector<8x80xf32>
    %64 = arith.subf %26, %63 : vector<8x80xf32>
    %65 = vector.broadcast %18 : vector<1x80xf32> to vector<8x80xf32>
    %66 = arith.mulf %64, %65 : vector<8x80xf32>
    %67 = arith.mulf %66, %66 : vector<8x80xf32>
    %cst_40 = arith.constant dense<0.000000e+00> : vector<8xf32>
    %68 = vector.multi_reduction <add>, %67, %cst_40 [1] : vector<8x80xf32> to vector<8xf32>
    %69 = vector.shape_cast %68 : vector<8xf32> to vector<8x1xf32>
    %70 = arith.addf %62, %69 : vector<8x1xf32>
    %71 = vector.broadcast %55 : vector<8x1xf32> to vector<8x80xf32>
    %72 = arith.subf %30, %71 : vector<8x80xf32>
    %73 = vector.broadcast %18 : vector<1x80xf32> to vector<8x80xf32>
    %74 = arith.mulf %72, %73 : vector<8x80xf32>
    %75 = arith.mulf %74, %74 : vector<8x80xf32>
    %cst_41 = arith.constant dense<0.000000e+00> : vector<8xf32>
    %76 = vector.multi_reduction <add>, %75, %cst_41 [1] : vector<8x80xf32> to vector<8xf32>
    %77 = vector.shape_cast %76 : vector<8xf32> to vector<8x1xf32>
    %78 = arith.addf %70, %77 : vector<8x1xf32>
    %79 = vector.broadcast %55 : vector<8x1xf32> to vector<8x80xf32>
    %80 = arith.subf %34, %79 : vector<8x80xf32>
    %81 = vector.broadcast %18 : vector<1x80xf32> to vector<8x80xf32>
    %82 = arith.mulf %80, %81 : vector<8x80xf32>
    %83 = arith.mulf %82, %82 : vector<8x80xf32>
    %cst_42 = arith.constant dense<0.000000e+00> : vector<8xf32>
    %84 = vector.multi_reduction <add>, %83, %cst_42 [1] : vector<8x80xf32> to vector<8xf32>
    %85 = vector.shape_cast %84 : vector<8xf32> to vector<8x1xf32>
    %86 = arith.addf %78, %85 : vector<8x1xf32>
    %cst_43 = arith.constant 3.906250e-03 : f32
    %87 = vector.broadcast %cst_43 : f32 to vector<8x1xf32>
    %88 = arith.mulf %86, %87 : vector<8x1xf32>
    %cst_44 = arith.constant 9.99999974E-6 : f32
    %89 = vector.broadcast %cst_44 : f32 to vector<8x1xf32>
    %90 = arith.addf %88, %89 : vector<8x1xf32>
    %91 = math.rsqrt %90 : vector<8x1xf32>
    %92 = vector.broadcast %55 : vector<8x1xf32> to vector<8x80xf32>
    %93 = arith.subf %22, %92 : vector<8x80xf32>
    %94 = vector.broadcast %91 : vector<8x1xf32> to vector<8x80xf32>
    %95 = arith.mulf %93, %94 : vector<8x80xf32>
    %cst_45 = arith.constant 0.000000e+00 : f32
    %96 = vector.broadcast %cst_45 : f32 to vector<8x80xf32>
    %97 = arith.maximumf %95, %96 : vector<8x80xf32>
    %c0_46 = arith.constant 0 : index
    %c0_47 = arith.constant 0 : index
    %c0_48 = arith.constant 0 : index
    %c0_49 = arith.constant 0 : index
    %98 = vector.load %arg4[%c0_46, %c0_47, %c0_48, %c0_49] : memref<1x4x8x80xf32, #tpu.memory_space<vmem>>, vector<1x1x8x80xf32>
    %99 = vector.shape_cast %98 : vector<1x1x8x80xf32> to vector<8x80xf32>
    %100 = vector.shape_cast %97 : vector<8x80xf32> to vector<1x1x8x80xf32>
    tpu.vector_store %arg4[%c0_46, %c0_47, %c0_48, %c0_49], %100 {strides = array<i32>} : memref<1x4x8x80xf32, #tpu.memory_space<vmem>>, vector<1x1x8x80xf32>,
    %101 = vector.broadcast %55 : vector<8x1xf32> to vector<8x80xf32>
    %102 = arith.subf %26, %101 : vector<8x80xf32>
    %103 = vector.broadcast %91 : vector<8x1xf32> to vector<8x80xf32>
    %104 = arith.mulf %102, %103 : vector<8x80xf32>
    %cst_50 = arith.constant 0.000000e+00 : f32
    %105 = vector.broadcast %cst_50 : f32 to vector<8x80xf32>
    %106 = arith.maximumf %104, %105 : vector<8x80xf32>
    %c0_51 = arith.constant 0 : index
    %c1_52 = arith.constant 1 : index
    %c0_53 = arith.constant 0 : index
    %c0_54 = arith.constant 0 : index
    %107 = vector.load %arg4[%c0_51, %c1_52, %c0_53, %c0_54] : memref<1x4x8x80xf32, #tpu.memory_space<vmem>>, vector<1x1x8x80xf32>
    %108 = vector.shape_cast %107 : vector<1x1x8x80xf32> to vector<8x80xf32>
    %109 = vector.shape_cast %106 : vector<8x80xf32> to vector<1x1x8x80xf32>
    tpu.vector_store %arg4[%c0_51, %c1_52, %c0_53, %c0_54], %109 {strides = array<i32>} : memref<1x4x8x80xf32, #tpu.memory_space<vmem>>, vector<1x1x8x80xf32>,
    %110 = vector.broadcast %55 : vector<8x1xf32> to vector<8x80xf32>
    %111 = arith.subf %30, %110 : vector<8x80xf32>
    %112 = vector.broadcast %91 : vector<8x1xf32> to vector<8x80xf32>
    %113 = arith.mulf %111, %112 : vector<8x80xf32>
    %cst_55 = arith.constant 0.000000e+00 : f32
    %114 = vector.broadcast %cst_55 : f32 to vector<8x80xf32>
    %115 = arith.maximumf %113, %114 : vector<8x80xf32>
    %c0_56 = arith.constant 0 : index
    %c2_57 = arith.constant 2 : index
    %c0_58 = arith.constant 0 : index
    %c0_59 = arith.constant 0 : index
    %116 = vector.load %arg4[%c0_56, %c2_57, %c0_58, %c0_59] : memref<1x4x8x80xf32, #tpu.memory_space<vmem>>, vector<1x1x8x80xf32>
    %117 = vector.shape_cast %116 : vector<1x1x8x80xf32> to vector<8x80xf32>
    %118 = vector.shape_cast %115 : vector<8x80xf32> to vector<1x1x8x80xf32>
    tpu.vector_store %arg4[%c0_56, %c2_57, %c0_58, %c0_59], %118 {strides = array<i32>} : memref<1x4x8x80xf32, #tpu.memory_space<vmem>>, vector<1x1x8x80xf32>,
    %119 = vector.broadcast %55 : vector<8x1xf32> to vector<8x80xf32>
    %120 = arith.subf %34, %119 : vector<8x80xf32>
    %121 = vector.broadcast %91 : vector<8x1xf32> to vector<8x80xf32>
    %122 = arith.mulf %120, %121 : vector<8x80xf32>
    %cst_60 = arith.constant 0.000000e+00 : f32
    %123 = vector.broadcast %cst_60 : f32 to vector<8x80xf32>
    %124 = arith.maximumf %122, %123 : vector<8x80xf32>
    %c0_61 = arith.constant 0 : index
    %c3_62 = arith.constant 3 : index
    %c0_63 = arith.constant 0 : index
    %c0_64 = arith.constant 0 : index
    %125 = vector.load %arg4[%c0_61, %c3_62, %c0_63, %c0_64] : memref<1x4x8x80xf32, #tpu.memory_space<vmem>>, vector<1x1x8x80xf32>
    %126 = vector.shape_cast %125 : vector<1x1x8x80xf32> to vector<8x80xf32>
    %127 = vector.shape_cast %124 : vector<8x80xf32> to vector<1x1x8x80xf32>
    tpu.vector_store %arg4[%c0_61, %c3_62, %c0_63, %c0_64], %127 {strides = array<i32>} : memref<1x4x8x80xf32, #tpu.memory_space<vmem>>, vector<1x1x8x80xf32>,
    return
  }
  func.func @transform_0(%arg0: i32) -> (i32, i32, i32) {
    %c0_i32 = arith.constant 0 : i32
    %c0_i32_0 = arith.constant 0 : i32
    %c0_i32_1 = arith.constant 0 : i32
    return %arg0, %c0_i32, %c0_i32_0 : i32, i32, i32
  }
  func.func @transform_1(%arg0: i32) -> (i32, i32, i32) {
    %c0_i32 = arith.constant 0 : i32
    %c0_i32_0 = arith.constant 0 : i32
    %c0_i32_1 = arith.constant 0 : i32
    %c0_i32_2 = arith.constant 0 : i32
    return %c0_i32, %c0_i32_0, %c0_i32_1 : i32, i32, i32
  }
  func.func @transform_2(%arg0: i32) -> (i32, i32) {
    %c0_i32 = arith.constant 0 : i32
    %c0_i32_0 = arith.constant 0 : i32
    %c0_i32_1 = arith.constant 0 : i32
    return %c0_i32, %c0_i32_0 : i32, i32
  }
  func.func @transform_3(%arg0: i32) -> (i32, i32, i32, i32) {
    %c0_i32 = arith.constant 0 : i32
    %c0_i32_0 = arith.constant 0 : i32
    %c0_i32_1 = arith.constant 0 : i32
    %c0_i32_2 = arith.constant 0 : i32
    return %arg0, %c0_i32, %c0_i32_0, %c0_i32_1 : i32, i32, i32, i32
  }
}

</mosaic_0001>

<bundles_post_ra>
// kernel: decoder_forward.1
= control target key start
LH: loop header
LB: loop body
LE: loop exit
PB: predicated region body
PF: predicated region fallthrough
CT: control target
= control target key end

     0   :  { %s666_s12 = smov 0   ;;  %s742_s0 = inlined_call_operand.vmem [shape: bf16[2,16,102], index: 0, kind: input, shape index: {}]   ;;  %s743_s1 = inlined_call_operand.vmem [shape: bf16[4,8,64], index: 1, kind: input, shape index: {}]   ;;  %s744_s2 = inlined_call_operand.vmem [shape: f32[1,80], index: 2, kind: input, shape index: {}]   ;;  %s745_s3 = inlined_call_operand.vmem [shape: f32[2,4,8,80], index: 3, kind: output, shape index: {}]  }
   0x1 LB: > { %s524_s13 = sadd.s32 4294967295, %s639_s12   ;;  %p528_p0 = scmp.ge.s32.totalorder %s639_s12, 1  ;;  %s639_s12 = sphi %s666_s12, %s13_s12  }
   0x2   : > { %p137_p1 = scmp.lt.s32.totalorder %s639_s12, 3 }
   0x4   : > { %p138_p2 = pnand %p528_p0, %p137_p1 }
   0x5   : > { %p161_p3 = scmp.lt.s32.totalorder (!%p138_p2), %s524_s13, 1  ;;  %v641_v0 = vmov (!%p138_p2), 0.0   ;;  %vm642_vm0 = vmmov (!%p138_p2), 0   ;;  %s643_s18 = smov (!%p138_p2), 127   ;;  %v190_v5 = vld [vmem:[%s743_s1] sm:$0xf] (!%p138_p2) }
   0x6   : > { %141 = sbr.rel (%p138_p2) target bundleno = 813 (0x32d), region = 32  ;;  %569 = vmatprep.subr.bf16.mxu0 (!%p138_p2), %v641_v0  ;;  %581 = vmatprep.subr.bf16.mxu1 (!%p138_p2), %v641_v0  ;;  %s644_s19 = smov (!%p138_p2), 117   ;;  %vm191_vm1 = vcmask (!%p138_p2), 523264   ;;  %v535_v10 = vld [vmem:[%s743_s1 + $0x4] sm:$0xf] (!%p138_p2)  ;;  %vm404_vm2 = vcmask (!%p138_p2), 654336  }
   0x7   : > { %577 = vmatprep.mubr.msk.bf16.mxu0 (!%p138_p2), %vm642_vm0, %v641_v0  ;;  %589 = vmatprep.mubr.msk.bf16.mxu1 (!%p138_p2), %vm642_vm0, %v641_v0  ;;  %s645_s20 = smov (!%p138_p2), 118   ;;  %v537_v14 = vld [vmem:[%s743_s1 + $0x8] sm:$0xf] (!%p138_p2)  ;;  %v539_v17 = vld [vmem:[%s743_s1 + $0xc] sm:$0xf] (!%p138_p2) }
   0x8   : > { %v541_v18 = vld [vmem:[%s744_s2] ss:$0 sm:$0xff] (!%p138_p2) }
   0xd   : > { %s747_s13 = smov (!%p161_p3, %s524_s13), 1 }
   0xe   : > { %s547_s14 = sshll.u32 %s747_s13, 3  ;;  %s548_s4 = sshll.u32 %s747_s13, 5 }
   0xf   : > { %s165_s17 = scalar_lea.vmem %s742_s0, %s547_s14  ;;  %s170_s7 = scalar_lea.vmem %s745_s3, %s548_s4 }
  0x10   : > { %v630_v1 = vld [vmem:[%s165_s17] sm:$0xff]  }
  0x11   : > { %181 = vrot.lane.b32.xlu0 %v630_v1, %s643_s18  ;;  %187 = vrot.lane.b32.xlu1 %v630_v1, %s644_s19 }
  0x12   : > { %570 = vmatpush3.bf16.msra.mxu0 %v630_v1 }
  0x13   : > { %571 = vmatprep.subr.bf16.mxu0 %v641_v0 }
  0x15   : > { %184 = vrot.lane.b32.xlu0 %v630_v1, %s645_s20 }
  0x83   : > { %v182_v2 = vpop.permute.xlu0 %181  ;;  %v188_v3 = vpop.permute.xlu1 %187 }
  0x84   : > { %582 = vmatpush3.bf16.msra.mxu1 %v182_v2  ;;  %237 = vrot.lane.b32.xlu1 %v182_v2, %s643_s18 }
  0x85   : > { %572 = vmatpush3.bf16.msra.mxu0 %v182_v2  ;;  %583 = vmatprep.subr.bf16.mxu1 %v641_v0 }
  0x86   : > { %573 = vmatprep.subr.bf16.mxu0 %v641_v0 }
  0x87   : > { %v185_v4 = vpop.permute.xlu0 %184 }
  0x88   : > { %241 = vrot.lane.b32.xlu1 %v188_v3, %s643_s18  ;;  %239 = vrot.lane.b32.xlu0 %v185_v4, %s643_s18 }
  0x89   : > { %574 = vmatpush3.bf16.msra.mxu0 %v185_v4 }
  0x8a   : > { %575 = vmatprep.subr.bf16.mxu0 %v641_v0 }
  0x8c   : > { %345 = vrot.lane.b32.xlu1 %v182_v2, %s644_s19  ;;  %291 = vrot.lane.b32.xlu0 %v182_v2, %s645_s20 }
  0x8d   : > { %576 = vmatpush3.bf16.msra.mxu0 %v188_v3 }
  0x8e   : > { %593 = vmatprep.subr.bf16.mxu0 %v641_v0 }
  0x90   : > { %347 = vrot.lane.b32.xlu1 %v185_v4, %s644_s19  ;;  %293 = vrot.lane.b32.xlu0 %v185_v4, %s645_s20 }
  0x91   : > { %578 = vmatmul.mubr.msk.bf16.vlgmr.msra.gmra.mrb[0].mxu0 %vm191_vm1, %v190_v5 }
  0x92   : > { %594 = vmatpush3.bf16.msra.mxu0 %v185_v4  ;;  %601 = vmatprep.mubr.msk.bf16.mxu0 %vm642_vm0, %v641_v0 }
  0x93   : > { %595 = vmatprep.subr.bf16.mxu0 %v641_v0 }
  0x94   : > { %349 = vrot.lane.b32.xlu1 %v188_v3, %s644_s19  ;;  %295 = vrot.lane.b32.xlu0 %v188_v3, %s645_s20 }
  0xf6   : > { %v238_v6 = vpop.permute.xlu1 %237 }
  0xf7   : > { %584 = vmatpush3.bf16.msra.mxu1 %v238_v6 }
  0xf8   : > { %585 = vmatprep.subr.bf16.mxu1 %v641_v0 }
  0xfa   : > { %v240_v7 = vpop.permute.xlu0 %239  ;;  %v242_v8 = vpop.permute.xlu1 %241 }
  0xfb   : > { %586 = vmatpush3.bf16.msra.mxu1 %v240_v7 }
  0xfc   : > { %587 = vmatprep.subr.bf16.mxu1 %v641_v0 }
  0xfe   : > { %v292_v9 = vpop.permute.xlu0 %291  ;;  %v346_v11 = vpop.permute.xlu1 %345 }
  0xff   : > { %588 = vmatpush3.bf16.msra.mxu1 %v242_v8  ;;  %596 = vmatpush3.bf16.msra.mxu0 %v292_v9 }
 0x100   : > { %605 = vmatprep.subr.bf16.mxu1 %v641_v0  ;;  %597 = vmatprep.subr.bf16.mxu0 %v641_v0 }
 0x102   : > { %590 = vmatmul.mubr.msk.bf16.vlgmr.msra.gmra.mrb[0].mxu1 %vm191_vm1, %v535_v10  ;;  %v294_v12 = vpop.permute.xlu0 %293  ;;  %v348_v15 = vpop.permute.xlu1 %347 }
 0x103   : > { %598 = vmatpush3.bf16.msra.mxu0 %v294_v12  ;;  %606 = vmatpush3.bf16.msra.mxu1 %v188_v3 }
 0x104   : > { %607 = vmatprep.subr.bf16.mxu1 %v641_v0  ;;  %599 = vmatprep.subr.bf16.mxu0 %v641_v0 }
 0x105   : > { %613 = vmatprep.mubr.msk.bf16.mxu1 %vm642_vm0, %v641_v0 }
 0x106   : > { %v296_v13 = vpop.permute.xlu0 %295  ;;  %v350_v16 = vpop.permute.xlu1 %349 }
 0x107   : > { %600 = vmatpush3.bf16.msra.mxu0 %v296_v13  ;;  %608 = vmatpush3.bf16.msra.mxu1 %v346_v11 }
 0x108   : > { %609 = vmatprep.subr.bf16.mxu1 %v641_v0 }
 0x10a   : > { %602 = vmatmul.mubr.msk.bf16.vlgmr.msra.gmra.mrb[4].mxu0 %vm191_vm1, %v537_v14 }
 0x10b   : > { %610 = vmatpush3.bf16.msra.mxu1 %v348_v15 }
 0x10c   : > { %611 = vmatprep.subr.bf16.mxu1 %v641_v0 }
 0x10f   : > { %612 = vmatpush3.bf16.msra.mxu1 %v350_v16 }
 0x112   : > { %614 = vmatmul.mubr.msk.bf16.vlgmr.msra.gmra.mrb[4].mxu1 %vm191_vm1, %v539_v17 }
 0x164   : > { %v229_v19 = vpop.f32.mrb[0].mxu0 }
 0x165   : > { %v403_v20 = vmul.f32 %v541_v18, %v229_v19  ;;  %v579_v21 = vpop.f32.mrb[1].mxu0 }
 0x166   : > { %v232_v22 = vpop.f32.mrb[2].mxu0 }
 0x167   : > { %v580_v23 = vpop.f32.mrb[3].mxu0  ;;  %v405_v24 = vsel %vm404_vm2, %v403_v20, 0.0 }
 0x168   : > { %406 = vadd.xlane.f32.xlu0 %v405_v24 }
 0x1d5   : > { %v283_v25 = vpop.f32.mrb[0].mxu1 }
 0x1d6   : > { %v408_v26 = vmul.f32 %v541_v18, %v283_v25  ;;  %v591_v27 = vpop.f32.mrb[1].mxu1 }
 0x1d7   : > { %v286_v28 = vpop.f32.mrb[2].mxu1 }
 0x1d8   : > { %v592_v29 = vpop.f32.mrb[3].mxu1  ;;  %v409_v30 = vsel %vm404_vm2, %v408_v26, 0.0 }
 0x1d9   : > { %410 = vadd.xlane.f32.xlu1 %v409_v30 }
 0x1dd   : > { %v337_v31 = vpop.f32.mrb[4].mxu0 }
 0x1de   : > { %v413_v32 = vmul.f32 %v541_v18, %v337_v31  ;;  %v603_v33 = vpop.f32.mrb[5].mxu0 }
 0x1df   : > { %v340_v34 = vpop.f32.mrb[6].mxu0 }
 0x1e0   : > { %v414_v35 = vsel %vm404_vm2, %v413_v32, 0.0  ;;  %v604_v36 = vpop.f32.mrb[7].mxu0 }
 0x1e1   : > { %415 = vadd.xlane.f32.xlu0 %v414_v35 }
 0x1e5   : > { %v391_v37 = vpop.f32.mrb[4].mxu1 }
 0x1e6   : > { %v418_v38 = vmul.f32 %v541_v18, %v391_v37  ;;  %v615_v39 = vpop.f32.mrb[5].mxu1 }
 0x1e7   : > { %v394_v40 = vpop.f32.mrb[6].mxu1 }
 0x1e8   : > { %v616_v41 = vpop.f32.mrb[7].mxu1  ;;  %v419_v42 = vsel %vm404_vm2, %v418_v38, 0.0 }
 0x1e9   : > { %420 = vadd.xlane.f32.xlu0 %v419_v42 }
 0x1f5   : > { %v407_v43 = vpop.xlane.xlu0 %406 }
 0x266   : > { %v411_v44 = vpop.xlane.xlu1 %410 }
 0x267   : > { %v412_v46 = vadd.f32 %v411_v44, %v407_v43 }
 0x26e   : > { %v416_v45 = vpop.xlane.xlu0 %415 }
 0x26f   : > { %v417_v47 = vadd.f32 %v416_v45, %v412_v46 }
 0x276   : > { %v421_v48 = vpop.xlane.xlu0 %420 }
 0x277   : > { %v422_v49 = vadd.f32 %v421_v48, %v417_v47 }
 0x279   : > { %v423_v50 = vmul.f32 0.00390625, %v422_v49 }
 0x27b   : > { %v430_v51 = vsub.f32 %v283_v25, %v423_v50  ;;  %v424_v52 = vsub.f32 %v229_v19, %v423_v50  ;;  %v444_v53 = vsub.f32 %v391_v37, %v423_v50  ;;  %v437_v54 = vsub.f32 %v337_v31, %v423_v50 }
 0x27d   : > { %v431_v55 = vmul.f32 %v541_v18, %v430_v51  ;;  %v425_v56 = vmul.f32 %v541_v18, %v424_v52  ;;  %v445_v57 = vmul.f32 %v541_v18, %v444_v53  ;;  %v438_v58 = vmul.f32 %v541_v18, %v437_v54 }
 0x27f   : > { %v432_v59 = vmul.f32 %v431_v55, %v431_v55  ;;  %v426_v60 = vmul.f32 %v425_v56, %v425_v56  ;;  %v446_v63 = vmul.f32 %v445_v57, %v445_v57  ;;  %v439_v0 = vmul.f32 %v438_v58, %v438_v58 }
 0x281   : > { %v433_v61 = vsel %vm404_vm2, %v432_v59, 0.0  ;;  %v427_v62 = vsel %vm404_vm2, %v426_v60, 0.0  ;;  %v447_v1 = vsel %vm404_vm2, %v446_v63, 0.0  ;;  %v440_v2 = vsel %vm404_vm2, %v439_v0, 0.0 }
 0x282   : > { %434 = vadd.xlane.f32.xlu0 %v433_v61  ;;  %428 = vadd.xlane.f32.xlu1 %v427_v62 }
 0x286   : > { %448 = vadd.xlane.f32.xlu0 %v447_v1  ;;  %441 = vadd.xlane.f32.xlu1 %v440_v2 }
 0x30f   : > { %v435_v3 = vpop.xlane.xlu0 %434  ;;  %v429_v4 = vpop.xlane.xlu1 %428 }
 0x310   : > { %v436_v5 = vadd.f32 %v435_v3, %v429_v4 }
 0x313   : > { %v442_v6 = vpop.xlane.xlu1 %441  ;;  %v449_v8 = vpop.xlane.xlu0 %448 }
 0x314   : > { %v443_v7 = vadd.f32 %v442_v6, %v436_v5 }
 0x316   : > { %v450_v9 = vadd.f32 %v449_v8, %v443_v7 }
 0x318   : > { %v451_v10 = vmul.f32 0.00390625, %v450_v9 }
 0x31a   : > { %v452_v11 = vadd.f32 1e-05, %v451_v10 }
 0x31c   : > { %631 = vrsqrt.f32 %v452_v11 }
 0x326   : > { %v632_v12 = vpop.eup %631 }
 0x327   : > { %v454_v13 = vmul.f32 %v632_v12, %v424_v52  ;;  %v457_v14 = vmul.f32 %v632_v12, %v430_v51  ;;  %v461_v15 = vmul.f32 %v632_v12, %v437_v54  ;;  %v465_v16 = vmul.f32 %v632_v12, %v444_v53 }
 0x329   : > { %v455_v17 = vmax.f32 %v454_v13, 0.0  ;;  %v458_v18 = vmax.f32 %v457_v14, 0.0  ;;  %v462_v19 = vmax.f32 %v461_v15, 0.0  ;;  %v466_v20 = vmax.f32 %v465_v16, 0.0 }
 0x32b   : > { %456 = vst.msk [vmem:[%s170_s7] sm:$0xff] %vm404_vm2, %v455_v17  ;;  %542 = vst.msk [vmem:[%s170_s7 + $0x8] sm:$0xff] %vm404_vm2, %v458_v18 }
 0x32c   : > { %543 = vst.msk [vmem:[%s170_s7 + $0x10] sm:$0xff] %vm404_vm2, %v462_v19  ;;  %544 = vst.msk [vmem:[%s170_s7 + $0x18] sm:$0xff] %vm404_vm2, %v466_v20 }
 0x32d PF: > { %s13_s12 = sadd.s32 1, %s639_s12  }
 0x32e   : > { %p10_p4 = scmp.ge.s32.totalorder %s13_s12, 4  }
 0x330   :  { %12 = sbr.rel (!%p10_p4) target bundleno = 1 (0x1), region = 68 }

</bundles_post_ra>
